<compile_context>
chip_gen: v5e
topology: v5e:2x2
jax: 0.10.0
libtpu: 0.0.40
codegen_flags: <defaults>
</compile_context>

<pallas_src>
import functools

import jax
import jax.numpy as jnp
from jax import lax
from jax.experimental import pallas as pl
from jax.experimental.pallas import tpu as pltpu

LANE = 128        # channel dims are zero-padded to a multiple of this
_PAD_L = 8        # sublane-aligned left halo width for the in-kernel 3x3 pad
_TM_MAX = 512     # max rows per 1x1-matmul grid step
EXPANSION = 4


def _round_up(x, m):
    return ((x + m - 1) // m) * m


def _pad_to(a, shape):
    cfg = tuple((0, t - s) for s, t in zip(a.shape, shape))
    if all(p == (0, 0) for p in cfg):
        return a
    return jnp.pad(a, cfg)


def _tile_m(m, tm_max=_TM_MAX, target_steps=4):
    """M-tile for the flattened 1x1 matmuls: biggest tile <= tm_max, but aim
    for ~target_steps grid steps so DMA overlaps compute and v7x megacore can
    split the parallel axis."""
    if m <= 8:
        return max(m, 1)
    if m >= tm_max * 2:
        return tm_max
    tm = _round_up(-(-m // target_steps), 8)
    return max(8, min(tm, tm_max, m))


# ----------------------------- Pallas kernels ------------------------------ #

def _matmul_shift_act_kernel(x_ref, w_ref, shift_ref, o_ref, *, apply_relu):
    # x: (TM, Cin), w: (Cin, Cout) with BN scale pre-folded, shift: (1, Cout).
    y = jnp.dot(x_ref[...], w_ref[...], preferred_element_type=jnp.float32)
    y = y + shift_ref[...]
    if apply_relu:
        y = jnp.maximum(y, 0.0)
    o_ref[...] = y.astype(o_ref.dtype)


def _matmul_shift_add_relu_kernel(x_ref, sc_ref, w_ref, shift_ref, o_ref):
    # Final 1x1 conv + BN-shift + identity-shortcut add + ReLU, fused.
    y = jnp.dot(x_ref[...], w_ref[...], preferred_element_type=jnp.float32)
    y = y + shift_ref[...] + sc_ref[...].astype(jnp.float32)
    o_ref[...] = jnp.maximum(y, 0.0).astype(o_ref.dtype)


def _conv1x1_proj_add_relu_kernel(x_ref, xs_ref, w_ref, ws_ref, shift_ref,
                                  ssh_ref, o_ref, *, stride):
    # Final 1x1 conv + BN-shift, projection-shortcut 1x1 conv (strided
    # subsample done in-kernel) + BN-shift, add, ReLU — all fused.
    bt, th, wout, cin = x_ref.shape
    cin_s = xs_ref.shape[-1]
    cout = w_ref.shape[-1]
    m = bt * th * wout

    y = jnp.dot(x_ref[...].reshape(m, cin), w_ref[...],
                preferred_element_type=jnp.float32) + shift_ref[...]

    xs = xs_ref[...]
    if stride > 1:
        # Strided sublane slicing is done on an unpacked f32 value.
        xs = xs.astype(jnp.float32)
    sc_in = xs[:, 0:(th - 1) * stride + 1:stride,
               0:(wout - 1) * stride + 1:stride, :]
    sc = jnp.dot(sc_in.reshape(m, cin_s).astype(ws_ref.dtype), ws_ref[...],
                 preferred_element_type=jnp.float32) + ssh_ref[...]

    out = jnp.maximum(y + sc, 0.0)
    o_ref[...] = out.reshape(bt, th, wout, cout).astype(o_ref.dtype)


def _conv3x3_shift_relu_kernel(x_ref, w_ref, shift_ref, o_ref, xp_ref, *,
                               hout, wout, stride):
    """3x3 conv (padding=1, stride) + BN-shift + ReLU.

    Halo padding is built in a f32 VMEM scratch (no XLA/HBM pad round trip);
    the left halo is _PAD_L columns so the interior store is sublane-aligned.
    The conv is a sum of 9 MXU dots on shifted views (no lane-axis im2col)."""
    bt, h, wd, cin = x_ref.shape
    cout = w_ref.shape[-1]
    m = bt * hout * wout

    xp_ref[...] = jnp.zeros_like(xp_ref)
    xp_ref[:, 1:h + 1, _PAD_L:_PAD_L + wd, :] = x_ref[...].astype(xp_ref.dtype)
    xp = xp_ref[...]

    acc = jnp.zeros((m, cout), jnp.float32)
    for kh in range(3):
        for kw in range(3):
            c0 = _PAD_L - 1 + kw
            tap = xp[:, kh:kh + (hout - 1) * stride + 1:stride,
                     c0:c0 + (wout - 1) * stride + 1:stride, :]
            acc = acc + jnp.dot(tap.reshape(m, cin).astype(w_ref.dtype),
                                w_ref[kh, kw],
                                preferred_element_type=jnp.float32)

    y = jnp.maximum(acc + shift_ref[...], 0.0)
    o_ref[...] = y.reshape(bt, hout, wout, cout).astype(o_ref.dtype)


# ------------------------------ Pallas wrappers ----------------------------- #

def conv1x1_shift_act(x_nhwc, w, shift, *, apply_relu, out_dtype=None):
    n, h, wd, cin = x_nhwc.shape
    cout = w.shape[1]
    m = n * h * wd
    out_dtype = out_dtype or x_nhwc.dtype
    x2 = x_nhwc.reshape(m, cin)
    tm = _tile_m(m)
    kernel = functools.partial(_matmul_shift_act_kernel, apply_relu=apply_relu)
    out2 = pl.pallas_call(
        kernel,
        out_shape=jax.ShapeDtypeStruct((m, cout), out_dtype),
        grid=(pl.cdiv(m, tm),),
        in_specs=[
            pl.BlockSpec((tm, cin), lambda i: (i, 0)),
            pl.BlockSpec((cin, cout), lambda i: (0, 0)),
            pl.BlockSpec((1, cout), lambda i: (0, 0)),
        ],
        out_specs=pl.BlockSpec((tm, cout), lambda i: (i, 0)),
        compiler_params=pltpu.CompilerParams(dimension_semantics=("parallel",)),
    )(x2, w, shift.reshape(1, cout))
    return out2.reshape(n, h, wd, cout)


def conv1x1_shift_add_relu(x_nhwc, sc_nhwc, w, shift, *, out_dtype=None):
    # Fused: conv3(1x1) + bn3-shift + identity shortcut add + ReLU.
    n, h, wd, cin = x_nhwc.shape
    cout = w.shape[1]
    m = n * h * wd
    out_dtype = out_dtype or x_nhwc.dtype
    x2 = x_nhwc.reshape(m, cin)
    sc2 = sc_nhwc.reshape(m, cout)
    tm = _tile_m(m)
    out2 = pl.pallas_call(
        _matmul_shift_add_relu_kernel,
        out_shape=jax.ShapeDtypeStruct((m, cout), out_dtype),
        grid=(pl.cdiv(m, tm),),
        in_specs=[
            pl.BlockSpec((tm, cin), lambda i: (i, 0)),
            pl.BlockSpec((tm, cout), lambda i: (i, 0)),
            pl.BlockSpec((cin, cout), lambda i: (0, 0)),
            pl.BlockSpec((1, cout), lambda i: (0, 0)),
        ],
        out_specs=pl.BlockSpec((tm, cout), lambda i: (i, 0)),
        compiler_params=pltpu.CompilerParams(dimension_semantics=("parallel",)),
    )(x2, sc2, w, shift.reshape(1, cout))
    return out2.reshape(n, h, wd, cout)


def conv1x1_proj_add_relu(x_nhwc, xs_nhwc, w, ws, shift, shift_s, *, stride,
                          out_dtype=None):
    # Fused: conv3(1x1) + bn3-shift + projection shortcut (strided 1x1 conv +
    # bn-shift, subsample folded in-kernel) + add + ReLU.
    n, hout, wout, cin = x_nhwc.shape
    _, _, ws_w, cin_s = xs_nhwc.shape
    cout = w.shape[-1]
    out_dtype = out_dtype or x_nhwc.dtype
    th = min(hout, max(1, 512 // max(wout, 1)))
    while hout % th:
        th -= 1
    kernel = functools.partial(_conv1x1_proj_add_relu_kernel, stride=stride)
    return pl.pallas_call(
        kernel,
        out_shape=jax.ShapeDtypeStruct((n, hout, wout, cout), out_dtype),
        grid=(n, hout // th),
        in_specs=[
            pl.BlockSpec((1, th, wout, cin), lambda b, r: (b, r, 0, 0)),
            pl.BlockSpec((1, th * stride, ws_w, cin_s), lambda b, r: (b, r, 0, 0)),
            pl.BlockSpec((cin, cout), lambda b, r: (0, 0)),
            pl.BlockSpec((cin_s, cout), lambda b, r: (0, 0)),
            pl.BlockSpec((1, cout), lambda b, r: (0, 0)),
            pl.BlockSpec((1, cout), lambda b, r: (0, 0)),
        ],
        out_specs=pl.BlockSpec((1, th, wout, cout), lambda b, r: (b, r, 0, 0)),
        compiler_params=pltpu.CompilerParams(
            dimension_semantics=("parallel", "parallel")),
    )(x_nhwc, xs_nhwc, w, ws, shift.reshape(1, cout), shift_s.reshape(1, cout))


def conv3x3_shift_relu(x_nhwc, w, shift, *, stride, out_dtype=None):
    n, h, wd, cin = x_nhwc.shape
    cout = w.shape[-1]
    hout = (h + 2 - 3) // stride + 1
    wout = (wd + 2 - 3) // stride + 1
    out_dtype = out_dtype or x_nhwc.dtype
    # Batch tile: a few hundred M rows per step, but keep >= 2 grid steps
    # (pipelining / v7x megacore) whenever the batch allows.
    rows = hout * wout
    bt = max(1, min(n, 256 // max(rows, 1)))
    if n >= 2:
        bt = min(bt, max(1, n // 2))
    while n % bt:
        bt -= 1
    kernel = functools.partial(_conv3x3_shift_relu_kernel,
                               hout=hout, wout=wout, stride=stride)
    return pl.pallas_call(
        kernel,
        out_shape=jax.ShapeDtypeStruct((n, hout, wout, cout), out_dtype),
        grid=(n // bt,),
        in_specs=[
            pl.BlockSpec((bt, h, wd, cin), lambda b: (b, 0, 0, 0)),
            pl.BlockSpec((3, 3, cin, cout), lambda b: (0, 0, 0, 0)),
            pl.BlockSpec((1, cout), lambda b: (0, 0)),
        ],
        out_specs=pl.BlockSpec((bt, hout, wout, cout), lambda b: (b, 0, 0, 0)),
        scratch_shapes=[pltpu.VMEM((bt, h + 2, wd + _PAD_L + 1, cin),
                                   jnp.float32)],
        compiler_params=pltpu.CompilerParams(dimension_semantics=("parallel",)),
    )(x_nhwc, w, shift.reshape(1, cout))


# ------------------------- parameters / forward pass ------------------------ #

def _bn_fold(gamma, beta, mean, var, eps=1e-5):
    scale = gamma / jnp.sqrt(var + eps)
    shift = beta - mean * scale
    return scale, shift


def init_bottleneck_params(key, in_planes, planes, stride=1):
    out_planes = planes * EXPANSION
    keys = jax.random.split(key, 16)

    def conv_w(k, shape, fan_in):
        return jax.random.normal(k, shape, jnp.float32) / jnp.sqrt(float(fan_in))

    def bn(kg, kb, km, kv, c):
        gamma = 1.0 + 0.1 * jax.random.normal(kg, (c,), jnp.float32)
        beta = 0.1 * jax.random.normal(kb, (c,), jnp.float32)
        mean = 0.1 * jax.random.normal(km, (c,), jnp.float32)
        var = 0.5 + jax.random.uniform(kv, (c,), jnp.float32)
        return _bn_fold(gamma, beta, mean, var)

    params = {
        "w1": conv_w(keys[0], (in_planes, planes), in_planes),        # 1x1: (Cin, Cout)
        "bn1": bn(keys[1], keys[2], keys[3], keys[4], planes),
        "w2": conv_w(keys[5], (3, 3, planes, planes), 9 * planes),    # 3x3: HWIO
        "bn2": bn(keys[6], keys[7], keys[8], keys[9], planes),
        "w3": conv_w(keys[10], (planes, out_planes), planes),
        "bn3": bn(keys[11], keys[12], keys[13], keys[14], out_planes),
    }
    has_shortcut = (stride != 1) or (in_planes != out_planes)
    if has_shortcut:
        ks = jax.random.split(keys[15], 5)
        params["ws"] = conv_w(ks[0], (in_planes, out_planes), in_planes)
        params["bns"] = bn(ks[1], ks[2], ks[3], ks[4], out_planes)
    return params, has_shortcut


def bottleneck_forward(x_nchw, params, has_shortcut, stride=1, use_bf16=False):
    """Pallas forward.  `use_bf16` halves activation/weight HBM bytes on every
    TPU generation (incl. v5e); accumulation stays f32 via
    preferred_element_type and the BN-shift/ReLU epilogues run in f32."""
    out_dtype = x_nchw.dtype
    cdt = jnp.bfloat16 if use_bf16 else out_dtype

    in_planes = x_nchw.shape[1]
    planes = params["w1"].shape[1]
    out_planes = planes * EXPANSION

    cin_p = _round_up(in_planes, LANE)
    cmid_p = _round_up(planes, LANE)
    cout_p = _round_up(out_planes, LANE)

    # NCHW -> NHWC + cast + zero-pad channels to a lane multiple, one XLA
    # fusion at the block boundary (every kernel is then lane-dense).
    # TODO(synk): keep NHWC (lane-padded) end-to-end across the network.
    x = jnp.transpose(x_nchw, (0, 2, 3, 1)).astype(cdt)
    xk = _pad_to(x, x.shape[:3] + (cin_p,))

    # Inference BatchNorm folded to (scale, shift); scale folded into the conv
    # weights so the kernel epilogue is just +shift (+ReLU).
    s1, b1 = params["bn1"]
    s2, b2 = params["bn2"]
    s3, b3 = params["bn3"]
    w1 = _pad_to(params["w1"] * s1[None, :], (cin_p, cmid_p)).astype(cdt)
    w2 = _pad_to(params["w2"] * s2[None, None, None, :],
                 (3, 3, cmid_p, cmid_p)).astype(cdt)
    w3 = _pad_to(params["w3"] * s3[None, :], (cmid_p, cout_p)).astype(cdt)
    b1p = _pad_to(b1, (cmid_p,))
    b2p = _pad_to(b2, (cmid_p,))
    b3p = _pad_to(b3, (cout_p,))

    out = conv1x1_shift_act(xk, w1, b1p, apply_relu=True, out_dtype=cdt)
    out = conv3x3_shift_relu(out, w2, b2p, stride=stride, out_dtype=cdt)

    if has_shortcut:
        ss, bs = params["bns"]
        wsp = _pad_to(params["ws"] * ss[None, :], (cin_p, cout_p)).astype(cdt)
        bsp = _pad_to(bs, (cout_p,))
        out = conv1x1_proj_add_relu(out, xk, w3, wsp, b3p, bsp, stride=stride,
                                    out_dtype=out_dtype)
    else:
        out = conv1x1_shift_add_relu(out, xk, w3, b3p, out_dtype=out_dtype)

    out = out[..., :out_planes]                       # drop lane padding
    return jnp.transpose(out, (0, 3, 1, 2))           # NHWC -> NCHW


def bottleneck_reference(x_nchw, params, has_shortcut, stride=1):
    # Pure-JAX reference (lax.conv) for correctness checking.
    x = jnp.transpose(x_nchw, (0, 2, 3, 1))
    dn = ("NHWC", "HWIO", "NHWC")

    def conv1x1(inp, w, s=1):
        return lax.conv_general_dilated(inp, w.reshape(1, 1, *w.shape),
                                        (s, s), "VALID", dimension_numbers=dn)

    def bn(inp, sc_sh):
        s, sh = sc_sh
        return inp * s + sh

    out = jax.nn.relu(bn(conv1x1(x, params["w1"]), params["bn1"]))
    out = lax.conv_general_dilated(out, params["w2"], (stride, stride),
                                   ((1, 1), (1, 1)), dimension_numbers=dn)
    out = jax.nn.relu(bn(out, params["bn2"]))
    out = bn(conv1x1(out, params["w3"]), params["bn3"])
    if has_shortcut:
        sc = bn(conv1x1(x[:, ::stride, ::stride, :], params["ws"]), params["bns"])
    else:
        sc = x
    return jnp.transpose(jax.nn.relu(out + sc), (0, 3, 1, 2))


if __name__ == "__main__":
    key = jax.random.PRNGKey(0)

    configs = [
        # (N, in_planes, planes, H, W, stride)
        (2, 8, 8, 8, 8, 1),    # projection shortcut (in_planes != planes*4)
        (2, 32, 8, 8, 8, 1),   # identity shortcut
        (2, 16, 8, 8, 8, 2),   # strided projection shortcut
    ]

    for idx, (N, IN_PLANES, PLANES, H, W, STRIDE) in enumerate(configs):
        k_x, k_p, key = jax.random.split(key, 3)
        x = jax.random.normal(k_x, (N, IN_PLANES, H, W), jnp.float32)
        params, has_shortcut = init_bottleneck_params(k_p, IN_PLANES, PLANES, STRIDE)

        out = jax.block_until_ready(
            bottleneck_forward(x, params, has_shortcut, stride=STRIDE))
        ref = bottleneck_reference(x, params, has_shortcut, stride=STRIDE)

        hout = (H + 2 - 3) // STRIDE + 1
        wout = (W + 2 - 3) // STRIDE + 1
        assert out.shape == (N, PLANES * EXPANSION, hout, wout)
        assert jnp.allclose(out, ref, atol=1e-4, rtol=1e-4), f"config {idx}: mismatch"

    # bf16 compute path (byte halving on v5e/v6e/v7x); f32 accum + f32 epilogue.
    # TODO(synk): tighten this check against a bf16-cast reference.
    N, IN_PLANES, PLANES, H, W, STRIDE = configs[0]
    k_x, k_p, key = jax.random.split(key, 3)
    x = jax.random.normal(k_x, (N, IN_PLANES, H, W), jnp.float32)
    params, has_shortcut = init_bottleneck_params(k_p, IN_PLANES, PLANES, STRIDE)
    out_bf = jax.block_until_ready(
        bottleneck_forward(x, params, has_shortcut, stride=STRIDE, use_bf16=True))
    ref = bottleneck_reference(x, params, has_shortcut, stride=STRIDE)
    assert out_bf.shape == ref.shape
    assert jnp.allclose(out_bf, ref, atol=1e-1, rtol=1e-1), "bf16 path mismatch"

    print("KERNEL_OK")
</pallas_src>

<mosaic_0001>
module attributes {stable_mosaic.version = 11 : i64} {
  func.func @_matmul_shift_act_kernel(%arg0: i32, %arg1: memref<32x128xf32, #tpu.memory_space<vmem>>, %arg2: memref<128x128xf32, #tpu.memory_space<vmem>>, %arg3: memref<1x128xf32, #tpu.memory_space<vmem>>, %arg4: memref<32x128xf32, #tpu.memory_space<vmem>>) attributes {dimension_semantics = [#tpu.dimension_semantics<parallel>], iteration_bounds = array<i64: 4>, scalar_prefetch = 0 : i64, scratch_operands = 0 : i64, tpu.core_type = #tpu.core_type<tc>, window_params = [{transform_indices = @transform_0, window_bounds = array<i64: 32, 128>}, {pipeline_mode = #tpu.pipeline_mode<synchronous>, transform_indices = @transform_1, window_bounds = array<i64: 128, 128>}, {pipeline_mode = #tpu.pipeline_mode<synchronous>, transform_indices = @transform_2, window_bounds = array<i64: 1, 128>}, {transform_indices = @transform_3, window_bounds = array<i64: 32, 128>}]} {
    %c0 = arith.constant 0 : index
    %c0_0 = arith.constant 0 : index
    %0 = vector.load %arg1[%c0, %c0_0] : memref<32x128xf32, #tpu.memory_space<vmem>>, vector<32x128xf32>
    %c0_1 = arith.constant 0 : index
    %c0_2 = arith.constant 0 : index
    %1 = vector.load %arg2[%c0_1, %c0_2] : memref<128x128xf32, #tpu.memory_space<vmem>>, vector<128x128xf32>
    %cst = arith.constant dense<0.000000e+00> : vector<32x128xf32>
    %2 = tpu.matmul %0, %1, %cst {dimension_numbers = #tpu.dot_dimension_numbers<[1], [0], [0], [1], [0, 0, 1, 1], [], []>} : vector<32x128xf32>, vector<128x128xf32>, vector<32x128xf32> -> vector<32x128xf32>
    %c0_3 = arith.constant 0 : index
    %c0_4 = arith.constant 0 : index
    %3 = vector.load %arg3[%c0_3, %c0_4] : memref<1x128xf32, #tpu.memory_space<vmem>>, vector<1x128xf32>
    %4 = vector.broadcast %3 : vector<1x128xf32> to vector<32x128xf32>
    %5 = arith.addf %2, %4 : vector<32x128xf32>
    %cst_5 = arith.constant 0.000000e+00 : f32
    %6 = vector.broadcast %cst_5 : f32 to vector<32x128xf32>
    %7 = arith.maximumf %5, %6 : vector<32x128xf32>
    %c0_6 = arith.constant 0 : index
    %c0_7 = arith.constant 0 : index
    %8 = vector.load %arg4[%c0_6, %c0_7] : memref<32x128xf32, #tpu.memory_space<vmem>>, vector<32x128xf32>
    tpu.vector_store %arg4[%c0_6, %c0_7], %7 {strides = array<i32>} : memref<32x128xf32, #tpu.memory_space<vmem>>, vector<32x128xf32>,
    return
  }
  func.func @transform_0(%arg0: i32) -> (i32, i32) {
    %c0_i32 = arith.constant 0 : i32
    %c0_i32_0 = arith.constant 0 : i32
    return %arg0, %c0_i32 : i32, i32
  }
  func.func @transform_1(%arg0: i32) -> (i32, i32) {
    %c0_i32 = arith.constant 0 : i32
    %c0_i32_0 = arith.constant 0 : i32
    %c0_i32_1 = arith.constant 0 : i32
    return %c0_i32, %c0_i32_0 : i32, i32
  }
  func.func @transform_2(%arg0: i32) -> (i32, i32) {
    %c0_i32 = arith.constant 0 : i32
    %c0_i32_0 = arith.constant 0 : i32
    %c0_i32_1 = arith.constant 0 : i32
    return %c0_i32, %c0_i32_0 : i32, i32
  }
  func.func @transform_3(%arg0: i32) -> (i32, i32) {
    %c0_i32 = arith.constant 0 : i32
    %c0_i32_0 = arith.constant 0 : i32
    return %arg0, %c0_i32 : i32, i32
  }
}

</mosaic_0001>

<bundles_post_ra>
// kernel: tpu_custom_call.1
= control target key start
LH: loop header
LB: loop body
LE: loop exit
PB: predicated region body
PF: predicated region fallthrough
CT: control target
= control target key end

     0   :  { %8 = vsyncpa [#allocation3], 0  ;;  %s810_s0 = inlined_call_operand.hbm [shape: f32[128,128], index: 0, kind: input, shape index: {}]   ;;  %s811_s1 = inlined_call_operand.hbm [shape: f32[128,128], index: 1, kind: input, shape index: {}]   ;;  %s812_s2 = inlined_call_operand.vmem [shape: f32[1,128], index: 2, kind: input, shape index: {}]   ;;  %s813_s3 = inlined_call_operand.hbm [shape: f32[128,128], index: 3, kind: output, shape index: {}]  }
   0x1   :  { %10 = vsyncpa [#allocation3 + $0x1], 0 }
   0x2   :  { %11 = vsyncpa [#allocation6], 0 }
   0x3   :  { %12 = vsyncpa [#allocation4], 0 }
   0x4   :  { %14 = vsyncpa [#allocation4 + $0x1], 0  ;;  %s655_s12 = smov 0   ;;  %s657_s13 = smov 0  }
   0x5   :  { %s659_s14 = smov 0   ;;  %s661_s15 = smov 0  }
   0x6 LB: > { %s676_s16 = sadd.s32 4294967295, %s628_s15   ;;  %s370_s17 = sadd.s32 4294967294, %s628_s15   ;;  %s628_s15 = sphi %s661_s15, %s822_s15   ;;  %s624_s14 = sphi %s659_s14, %s821_s14   ;;  %s620_s13 = sphi %s657_s13, %s820_s13   ;;  %s616_s12 = sphi %s655_s12, %s819_s12  }
   0x7   : > { %p40_p0 = scmp.ne.s32.totalorder %s620_s13, %s616_s12  ;;  %p41_p1 = scmp.eq.s32.totalorder %s676_s16, 0 }
   0x8   : > { %p106_p2 = scmp.eq.s32.totalorder %s676_s16, 3  ;;  %p112_p3 = scmp.eq.s32.totalorder %s370_s17, 3 }
   0x9   : > { %p685_p4 = por %p41_p1, %p40_p0  ;;  %p371_p5 = scmp.ge.s32.totalorder %s628_s15, 1 }
   0xa   : > { %p690_p6 = por %p112_p3, %p40_p0  ;;  %p119_p7 = scmp.lt.s32.totalorder %s628_s15, 5 }
   0xb   : > { %s130_s22 = sshll.u32 %s811_s1, 4  ;;  %s630_s24 = smov [#allocation5]   ;;  %s131_s22 = int_to_ptr.hbm [resolvable:$true] %s130_s22 }
   0xc   : > { %p698_p8 = pnand %p371_p5, %p119_p7  ;;  %s132_s25 = sshll.u32 %s630_s24, 4  ;;  %s133_s25 = int_to_ptr.vmem [resolvable:$true] %s132_s25 }
   0xd   : > { %s707_s26 = sadd.s32 1, %s628_s15   ;;  %s631_s27 = smov 128  }
   0xe   : > { %p444_p9 = pneg %p698_p8  ;;  %s632_s28 = smov 8  }
   0xf   : > { %s24_s29 = ssub.s32 %s628_s15, %s707_s26  ;;  %s27_s30 = sadd.s32 1, %s624_s14 }
  0x10   : > { %p445_p10 = pnand %p444_p9, %p41_p1  ;;  %p25_p11 = scmp.eq.s32.totalorder %s24_s29, 0 }
  0x11   : > { %p34_p12 = scmp.ne.s32.totalorder %s624_s14, %s620_s13  ;;  %p35_p13 = scmp.eq.s32.totalorder %s628_s15, 0 }
  0x12   : > { %447 = dma.hbm_to_vmem [thread:$0]  (!%p445_p10), %s131_s22, 2048, %s133_s25, [#allocation6], %s631_s27, %s631_s27, %s632_s28  }
  0x13   : > { %s719_s4 = scalar_select %p25_p11, %s624_s14, %s27_s30  }
  0x14   : > { %p723_p0 = por %p106_p2, %p34_p12  ;;  %p457_p3 = scmp.lt.s32.totalorder %s628_s15, 4 }
  0x15   : > { %s149_s6 = sand.u32 1, %s624_s14   ;;  %s386_s7 = sshll.u32 %s628_s15, 5 }
  0x16   : > { %p36_p5 = por %p35_p13, %p34_p12  ;;  %s374_s8 = sshll.u32 %s149_s6, 5 }
  0x17   : > { %s158_s11 = scalar_lea.hbm %s810_s0, %s386_s7  ;;  %s153_s20 = scalar_lea.vmem [#allocation2], %s374_s8 }
  0x18   : > { %s159_s17 = sshll.u32 %s158_s11, 4  ;;  %s161_s21 = sshll.u32 %s153_s20, 4  ;;  %s160_s17 = int_to_ptr.hbm [resolvable:$true] %s159_s17  ;;  %s162_s21 = int_to_ptr.vmem [resolvable:$true] %s161_s21 }
  0x19   : > { %p733_p7 = pnand %p457_p3, %p36_p5  ;;  %s150_s24 = scalar_lea.sflag [#allocation3], %s149_s6 }
  0x1a   : > { %s528_s25 = sshra.s32 %s160_s17, 4  ;;  %s535_s8 = scalar_lea.hbm %s810_s0, 128  ;;  %s529_s25 = int_to_ptr.hbm [resolvable:$true] %s528_s25 }
  0x1b   : > { %s530_s29 = scalar_lea.hbm %s529_s25, 32  ;;  %p532_p9 = pneg %p733_p7 }
  0x1c   : > { %p531_p2 = scmp.ne.s32.totalorder %s529_s25, %s530_s29  ;;  %p536_p12 = scmp.lt.s32.totalorder %s529_s25, %s810_s0 }
  0x1d   : > { %p537_p13 = scmp.lt.s32.totalorder %s535_s8, %s530_s29 }
  0x1e   : > { %p533_p10 = pnand %p532_p9, %p531_p2 }
  0x1f   : > { %p538_p3 = por %p537_p13, %p536_p12 }
  0x20   : > { %p534_p11 = pneg %p533_p10 }
  0x22   : > { %p539_p5 = pnand %p538_p3, %p534_p11 }
  0x24   : > { %542 = shalt.err (!%p539_p5)
}
  0x25   : > { %451 = dma.hbm_to_vmem [thread:$0]  (!%p733_p7), %s160_s17, 512, %s162_s21, %s150_s24, %s631_s27, %s631_s27, %s632_s28  }
  0x26   : > { %173 = sbr.rel (%p698_p8) target bundleno = 219 (0xdb), region = 32  ;;  %s753_s6 = sand.u32 (!%p698_p8), 1, %s620_s13  }
  0x27   : > { %s378_s11 = sshll.u32 (!%p698_p8), %s753_s6, 5  ;;  %s176_s20 = scalar_lea.sflag (!%p698_p8), [#allocation3], %s753_s6 }
  0x28   : > { %s759_s25 = scalar_lea.vmem (!%p698_p8), [#allocation2], %s378_s11 }
  0x2b   : > { %603 = dma.done.wait (%p685_p4), %s176_s20, 512  }
  0x2c   : > { %605 = vsyncadd (%p685_p4), %s176_s20, 4294966784 }
  0x2d   : > { %607 = dma.done.wait (%p41_p1), [#allocation6], 2048  }
  0x2e   : > { %609 = vsyncadd (%p41_p1), [#allocation6], 4294965248  ;;  %v229_v0 = vld [vmem:[#allocation5 + $0x78] sm:$0xff]  ;;  %v228_v1 = vld [vmem:[#allocation5 + $0x70] sm:$0xff]  ;;  %s387_s27 = sshll.u32 %s676_s16, 5  ;;  %s207_s22 = scalar_lea.vmem [#allocation7], %s378_s11 }
  0x2f   : > { %389 = vmatpush.msra.mxu2 %v229_v0  ;;  %390 = vmatpush.msra.mxu3 %v229_v0  ;;  %v227_v2 = vld [vmem:[#allocation5 + $0x68] sm:$0xff]  ;;  %v226_v3 = vld [vmem:[#allocation5 + $0x60] sm:$0xff]  ;;  %v225_v4 = vld [vmem:[#allocation5 + $0x58] sm:$0xff]  ;;  %s283_s21 = scalar_lea.hbm %s813_s3, %s387_s27  ;;  %s284_s24 = sshll.u32 %s207_s22, 4  ;;  %s285_s24 = int_to_ptr.vmem [resolvable:$true] %s284_s24 }
  0x30   : > { %234 = vmatpush.msra.mxu0 %v229_v0  ;;  %388 = vmatpush.msra.mxu1 %v229_v0  ;;  %v224_v5 = vld [vmem:[#allocation5 + $0x50] sm:$0xff]  ;;  %v223_v6 = vld [vmem:[#allocation5 + $0x48] sm:$0xff]  ;;  %v222_v7 = vld [vmem:[#allocation5 + $0x40] sm:$0xff]  ;;  %s286_s29 = sshll.u32 %s283_s21, 4  ;;  %s272_s16 = scalar_lea.sflag [#allocation4], %s753_s6  ;;  %s287_s29 = int_to_ptr.hbm [resolvable:$true] %s286_s29 }
  0x31   : > { %392 = vmatpush.msra.mxu2 %v228_v1  ;;  %393 = vmatpush.msra.mxu3 %v228_v1  ;;  %v221_v8 = vld [vmem:[#allocation5 + $0x38] sm:$0xff]  ;;  %v220_v9 = vld [vmem:[#allocation5 + $0x30] sm:$0xff]  ;;  %v219_v10 = vld [vmem:[#allocation5 + $0x28] sm:$0xff]  ;;  %s572_s30 = sshra.s32 %s287_s29, 4  ;;  %s578_s10 = scalar_lea.hbm %s813_s3, 128  ;;  %s573_s30 = int_to_ptr.hbm [resolvable:$true] %s572_s30 }
  0x32   : > { %235 = vmatpush.msra.mxu0 %v228_v1  ;;  %391 = vmatpush.msra.mxu1 %v228_v1  ;;  %v218_v11 = vld [vmem:[#allocation5 + $0x20] sm:$0xff]  ;;  %v217_v12 = vld [vmem:[#allocation5 + $0x18] sm:$0xff]  ;;  %v216_v13 = vld [vmem:[#allocation5 + $0x10] sm:$0xff]  ;;  %s574_s7 = scalar_lea.hbm %s573_s30, 32  ;;  %p579_p7 = scmp.lt.s32.totalorder %s573_s30, %s813_s3 }
  0x33   : > { %395 = vmatpush.msra.mxu2 %v227_v2  ;;  %396 = vmatpush.msra.mxu3 %v227_v2  ;;  %v215_v14 = vld [vmem:[#allocation5 + $0x8] sm:$0xff]  ;;  %v214_v15 = vld [vmem:[#allocation5] sm:$0xff]  ;;  %v212_v16 = vld [vmem:[%s759_s25 + $0x10] sm:$0xff]  ;;  %p575_p1 = scmp.ne.s32.totalorder %s573_s30, %s574_s7  ;;  %p580_p2 = scmp.lt.s32.totalorder %s578_s10, %s574_s7 }
  0x34   : > { %236 = vmatpush.msra.mxu0 %v227_v2  ;;  %394 = vmatpush.msra.mxu1 %v227_v2  ;;  %v213_v17 = vld [vmem:[%s759_s25 + $0x18] sm:$0xff]  ;;  %v210_v18 = vld [vmem:[%s759_s25] sm:$0xff]  ;;  %v211_v19 = vld [vmem:[%s759_s25 + $0x8] sm:$0xff] }
  0x35   : > { %398 = vmatpush.msra.mxu2 %v226_v3  ;;  %399 = vmatpush.msra.mxu3 %v226_v3  ;;  %v497_v20 = vld [vmem:[%s812_s2] ss:$0 sm:$0xff]  ;;  %p576_p4 = pnand %p575_p1, %p723_p0  ;;  %p581_p9 = por %p580_p2, %p579_p7 }
  0x36   : > { %237 = vmatpush.msra.mxu0 %v226_v3  ;;  %397 = vmatpush.msra.mxu1 %v226_v3 }
  0x37   : > { %401 = vmatpush.msra.mxu2 %v225_v4  ;;  %402 = vmatpush.msra.mxu3 %v225_v4  ;;  %p577_p8 = pneg %p576_p4 }
  0x38   : > { %238 = vmatpush.msra.mxu0 %v225_v4  ;;  %400 = vmatpush.msra.mxu1 %v225_v4 }
  0x39   : > { %404 = vmatpush.msra.mxu2 %v224_v5  ;;  %405 = vmatpush.msra.mxu3 %v224_v5  ;;  %p582_p10 = pnand %p581_p9, %p577_p8 }
  0x3a   : > { %239 = vmatpush.msra.mxu0 %v224_v5  ;;  %403 = vmatpush.msra.mxu1 %v224_v5 }
  0x3b   : > { %407 = vmatpush.msra.mxu2 %v223_v6  ;;  %408 = vmatpush.msra.mxu3 %v223_v6 }
  0x3c   : > { %240 = vmatpush.msra.mxu0 %v223_v6  ;;  %406 = vmatpush.msra.mxu1 %v223_v6 }
  0x3d   : > { %410 = vmatpush.msra.mxu2 %v222_v7  ;;  %411 = vmatpush.msra.mxu3 %v222_v7 }
  0x3e   : > { %241 = vmatpush.msra.mxu0 %v222_v7  ;;  %409 = vmatpush.msra.mxu1 %v222_v7 }
  0x3f   : > { %413 = vmatpush.msra.mxu2 %v221_v8  ;;  %414 = vmatpush.msra.mxu3 %v221_v8 }
  0x40   : > { %242 = vmatpush.msra.mxu0 %v221_v8  ;;  %412 = vmatpush.msra.mxu1 %v221_v8 }
  0x41   : > { %416 = vmatpush.msra.mxu2 %v220_v9  ;;  %417 = vmatpush.msra.mxu3 %v220_v9 }
  0x42   : > { %243 = vmatpush.msra.mxu0 %v220_v9  ;;  %415 = vmatpush.msra.mxu1 %v220_v9 }
  0x43   : > { %419 = vmatpush.msra.mxu2 %v219_v10  ;;  %420 = vmatpush.msra.mxu3 %v219_v10 }
  0x44   : > { %244 = vmatpush.msra.mxu0 %v219_v10  ;;  %418 = vmatpush.msra.mxu1 %v219_v10 }
  0x45   : > { %422 = vmatpush.msra.mxu2 %v218_v11  ;;  %423 = vmatpush.msra.mxu3 %v218_v11 }
  0x46   : > { %245 = vmatpush.msra.mxu0 %v218_v11  ;;  %421 = vmatpush.msra.mxu1 %v218_v11 }
  0x47   : > { %425 = vmatpush.msra.mxu2 %v217_v12  ;;  %426 = vmatpush.msra.mxu3 %v217_v12 }
  0x48   : > { %246 = vmatpush.msra.mxu0 %v217_v12  ;;  %424 = vmatpush.msra.mxu1 %v217_v12 }
  0x49   : > { %428 = vmatpush.msra.mxu2 %v216_v13  ;;  %429 = vmatpush.msra.mxu3 %v216_v13 }
  0x4a   : > { %247 = vmatpush.msra.mxu0 %v216_v13  ;;  %427 = vmatpush.msra.mxu1 %v216_v13 }
  0x4b   : > { %431 = vmatpush.msra.mxu2 %v215_v14  ;;  %432 = vmatpush.msra.mxu3 %v215_v14 }
  0x4c   : > { %248 = vmatpush.msra.mxu0 %v215_v14  ;;  %430 = vmatpush.msra.mxu1 %v215_v14 }
  0x4d   : > { %434 = vmatpush.msra.mxu2 %v214_v15  ;;  %435 = vmatpush.msra.mxu3 %v214_v15 }
  0x4e   : > { %256 = vmatmul.f32.vlgmr.msra.gmra.mxu2 %v212_v16  ;;  %259 = vmatmul.f32.vlgmr.msra.gmra.mxu3 %v213_v17 }
  0x4f   : > { %249 = vmatpush.msra.mxu0 %v214_v15  ;;  %433 = vmatpush.msra.mxu1 %v214_v15 }
  0x50   : > { %250 = vmatmul.f32.vlgmr.msra.gmra.mxu0 %v210_v18  ;;  %253 = vmatmul.f32.vlgmr.msra.gmra.mxu1 %v211_v19 }
  0xcd   : > { %v251_v21 = vpop.f32.mrf.mxu0  ;;  %v254_v22 = vpop.f32.mrf.mxu1 }
  0xce   : > { %v252_v23 = vadd.f32 %v497_v20, %v251_v21  ;;  %v255_v24 = vadd.f32 %v497_v20, %v254_v22 }
  0xd0   : > { %v263_v25 = vmax.f32 %v252_v23, 0.0  ;;  %v264_v26 = vmax.f32 %v255_v24, 0.0 }
  0xd1   : > { %v257_v27 = vpop.f32.mrf.mxu2  ;;  %v260_v28 = vpop.f32.mrf.mxu3 }
  0xd2   : > { %267 = vst [vmem:[%s207_s22] sm:$0xff] %v263_v25  ;;  %v258_v29 = vadd.f32 %v497_v20, %v257_v27  ;;  %v261_v30 = vadd.f32 %v497_v20, %v260_v28 }
  0xd3   : > { %268 = vst [vmem:[%s207_s22 + $0x8] sm:$0xff] %v264_v26 }
  0xd4   : > { %v265_v31 = vmax.f32 %v258_v29, 0.0  ;;  %v266_v32 = vmax.f32 %v261_v30, 0.0 }
  0xd6   : > { %269 = vst [vmem:[%s207_s22 + $0x10] sm:$0xff] %v265_v31 }
  0xd7   : > { %270 = vst [vmem:[%s207_s22 + $0x18] sm:$0xff] %v266_v32 }
  0xd8   : > { %585 = shalt.err (!%p582_p10)
}
  0xd9   : > { %s633_s6 = smov 128   ;;  %s634_s25 = smov 8  }
  0xda   : > { %442 = dma.vmem_to_hbm [thread:$0]  (%p723_p0), %s285_s24, 512, %s287_s29, %s272_s16, %s633_s6, %s633_s6, %s634_s25  }
  0xdb PF: > { %p459_p11 = scmp.ge.s32.totalorder %s628_s15, 2  ;;  %s301_s18 = sand.u32 1, %s616_s12  }
  0xdc   : > { %s302_s23 = scalar_lea.sflag [#allocation4], %s301_s18 }
  0xdd   : > { %p453_p12 = pnand %p459_p11, %p690_p6 }
  0xdf   : > { %p454_p13 = pneg %p453_p12 }
  0xe1   : > { %611 = dma.done.wait (%p454_p13), %s302_s23, 512  }
  0xe2   : > { %613 = vsyncadd (%p454_p13), %s302_s23, 4294966784  ;;  %p17_p3 = scmp.ge.s32.totalorder %s707_s26, 6   ;;  %s819_s12 = smov %s620_s13 }
  0xe3   : > { %s820_s13 = smov %s624_s14  ;;  %s821_s14 = smov %s719_s4 }
  0xe4   : > { %s822_s15 = smov %s707_s26  ;;  %19 = sbr.rel (!%p17_p3) target bundleno = 6 (0x6), region = 81 }
  0xe9   :  { %308 = vsyncpa [#allocation3], 1 }
  0xea   :  { %310 = vsyncpa [#allocation3 + $0x1], 1 }
  0xeb   :  { %311 = vsyncpa [#allocation6], 1 }
  0xec   :  { %312 = vsyncpa [#allocation4], 1 }
  0xed   :  { %314 = vsyncpa [#allocation4 + $0x1], 1 }

</bundles_post_ra>
